<compile_context>
chip_gen: v6e
topology: v6e:2x2x1
jax: 0.10.0
libtpu: 0.0.40
codegen_flags: <defaults>
</compile_context>

<pallas_src>
import jax
import jax.numpy as jnp
from jax.experimental import pallas as pl
from jax.experimental.pallas import tpu as pltpu

LANE = 128


def _round_up(x, m):
    return (x + m - 1) // m * m


def _cdiv(a, b):
    return (a + b - 1) // b


# ----------------------------------------------------------------------------
# Kernels
# ----------------------------------------------------------------------------
def _fused_double_q_kernel(x_ref, w1_ref, b1_ref, w2_ref, b2_ref, w3_ref,
                           b3_ref, out_ref):
    """Both towers fused into one lane-padded net (2*H <= 128).

    h1 = relu(x @ W1 + b1)        # [TB, HP], HP = 128
    h2 = relu(h1 @ W2_blkdiag + b2)
    q  = h2 @ W3 + b3             # [TB, 2]  (col 0 = Q1, col 1 = Q2)
    """
    cdt = w1_ref.dtype
    h = jnp.dot(x_ref[...], w1_ref[...],
                preferred_element_type=jnp.float32) + b1_ref[...]
    h = jnp.maximum(h, 0.0).astype(cdt)
    h = jnp.dot(h, w2_ref[...],
                preferred_element_type=jnp.float32) + b2_ref[...]
    h = jnp.maximum(h, 0.0).astype(cdt)
    out_ref[...] = jnp.dot(h, w3_ref[...],
                           preferred_element_type=jnp.float32) + b3_ref[...]


def _split_double_q_kernel(x_ref, w1_ref, b1_ref, w2_ref, b2_ref, w3_ref,
                           b3_ref, out_ref):
    """Towers share one layer-1 dot, then split (2*H > 128).

    h1 = relu(x @ [W1_q1 | W1_q2] + b1)    # [TB, 2*HPAD]
    per tower t: h2_t = relu(h1[:, t] @ W2_t + b2_t); q_t = h2_t @ W3_t
    """
    cdt = w1_ref.dtype
    hp = w2_ref.shape[1]  # per-tower lane-padded hidden width
    h1 = jnp.dot(x_ref[...], w1_ref[...],
                 preferred_element_type=jnp.float32) + b1_ref[...]
    h1 = jnp.maximum(h1, 0.0).astype(cdt)
    q = b3_ref[...]  # [1, 2] f32, broadcasts
    for t in range(2):  # static unroll over the two towers
        ht = h1[:, t * hp:(t + 1) * hp]
        h2 = (jnp.dot(ht, w2_ref[t], preferred_element_type=jnp.float32)
              + b2_ref[:, t * hp:(t + 1) * hp])
        h2 = jnp.maximum(h2, 0.0).astype(cdt)
        q = q + jnp.dot(h2, w3_ref[t], preferred_element_type=jnp.float32)
    out_ref[...] = q


# ----------------------------------------------------------------------------
# Parameter packing (call ONCE per weight update, outside the forward path)
# ----------------------------------------------------------------------------
def pack_double_q_params(params, *, dtype=jnp.bfloat16):
    """Pack two towers into lane-padded bf16 weights + f32 biases.

    params: dict with keys "q1"/"q2", each a tuple of
        (W1 [in,H], b1 [1,H] or [H], W2 [H,H], b2, W3 [H,1], b3 [1,1]).
    Layout is chosen from H:
      * 2*H <= 128 -> fused block-diagonal layout (W2 2-D).
      * otherwise  -> per-tower stacked layout   (W2 3-D, [2, HPAD, HPAD]).
    """
    w1_1, b1_1, w2_1, b2_1, w3_1, b3_1 = params["q1"]
    w1_2, b1_2, w2_2, b2_2, w3_2, b3_2 = params["q2"]
    in_dim, H = w1_1.shape
    f32 = jnp.float32

    if 2 * H <= LANE:
        HP = LANE
        pad_c = HP - 2 * H
        w1 = jnp.pad(jnp.concatenate([w1_1, w1_2], axis=1),
                     ((0, 0), (0, pad_c)))
        b1 = jnp.pad(jnp.concatenate(
            [b1_1.reshape(1, H), b1_2.reshape(1, H)], axis=1),
            ((0, 0), (0, pad_c)))
        z = jnp.zeros((H, H), f32)
        w2 = jnp.pad(jnp.concatenate(
            [jnp.concatenate([w2_1, z], axis=1),
             jnp.concatenate([z, w2_2], axis=1)], axis=0),
            ((0, pad_c), (0, pad_c)))
        b2 = jnp.pad(jnp.concatenate(
            [b2_1.reshape(1, H), b2_2.reshape(1, H)], axis=1),
            ((0, 0), (0, pad_c)))
        col0 = jnp.pad(w3_1.reshape(H, 1), ((0, HP - H), (0, 0)))
        col1 = jnp.pad(w3_2.reshape(H, 1), ((H, HP - 2 * H), (0, 0)))
        w3 = jnp.concatenate([col0, col1], axis=1)              # [HP, 2]
    else:
        # NOTE: when H is a multiple of 256, HPAD is too -> full MXU columns
        # on v6e/v7x (256-wide MXU).
        HPAD = _round_up(H, LANE)
        pad_h = HPAD - H

        def pad_cols(w):                     # [in, H] -> [in, HPAD]
            return jnp.pad(w, ((0, 0), (0, pad_h)))

        def pad_bias(b):                     # -> [1, HPAD]
            return jnp.pad(b.reshape(1, H), ((0, 0), (0, pad_h)))

        def pad_sq(w):                       # [H, H] -> [HPAD, HPAD]
            return jnp.pad(w, ((0, pad_h), (0, pad_h)))

        w1 = jnp.concatenate([pad_cols(w1_1), pad_cols(w1_2)], axis=1)
        b1 = jnp.concatenate([pad_bias(b1_1), pad_bias(b1_2)], axis=1)
        w2 = jnp.stack([pad_sq(w2_1), pad_sq(w2_2)], axis=0)    # [2,HPAD,HPAD]
        b2 = jnp.concatenate([pad_bias(b2_1), pad_bias(b2_2)], axis=1)
        w3_t1 = jnp.pad(w3_1.reshape(H, 1), ((0, pad_h), (0, 1)))  # col 0
        w3_t2 = jnp.pad(w3_2.reshape(H, 1), ((0, pad_h), (1, 0)))  # col 1
        w3 = jnp.stack([w3_t1, w3_t2], axis=0)                  # [2, HPAD, 2]

    b3 = jnp.concatenate(
        [b3_1.reshape(1, 1), b3_2.reshape(1, 1)], axis=1).astype(f32)
    return dict(
        w1=w1.astype(dtype), b1=b1.astype(f32),
        w2=w2.astype(dtype), b2=b2.astype(f32),
        w3=w3.astype(dtype), b3=b3,
    )


# ----------------------------------------------------------------------------
# Forward wrapper
# ----------------------------------------------------------------------------
def double_q_critic(obs, action, packed, *, batch_tile=4096):
    """obs: [B, obs_dim], action: [B, action_dim] -> (q1, q2), each [B, 1] f32."""
    assert obs.shape[0] == action.shape[0]
    B = obs.shape[0]
    w1, b1 = packed["w1"], packed["b1"]
    w2, b2 = packed["w2"], packed["b2"]
    w3, b3 = packed["w3"], packed["b3"]
    fused = (w2.ndim == 2)
    in_dim = w1.shape[0]
    width = w1.shape[1]                 # total hidden lanes (HP or 2*HPAD)
    dtype = w1.dtype
    assert obs.shape[1] + action.shape[1] == in_dim

    # --- batch tiling -------------------------------------------------------
    # Cap TB so the f32/bf16 intermediates (~18 B per hidden lane per row,
    # conservatively) stay well inside the 32 MiB scoped-VMEM budget.
    vmem_cap_tb = max(8, ((12 * 1024 * 1024) // (18 * width)) // 8 * 8)
    tb_max = max(8, min(batch_tile, vmem_cap_tb))

    B8 = _round_up(B, 8)
    if B8 <= 8:
        n_tiles = 1
    else:
        n_tiles = max(2, _cdiv(B8, tb_max))     # >=2 tiles: feed both v7x TCs
        if n_tiles % 2:
            n_tiles += 1                        # even split across 2 cores
    TB = _round_up(_cdiv(B8, n_tiles), 8)
    B_pad = TB * n_tiles

    # One wrapper-side concat (cheap: B * in_dim * 2 bytes), merged layer-1 dot.
    x = jnp.concatenate([obs, action], axis=-1).astype(dtype)
    if B_pad != B:
        x = jnp.pad(x, ((0, B_pad - B), (0, 0)))

    kernel = _fused_double_q_kernel if fused else _split_double_q_kernel

    row_map = lambda i: (i, 0)          # batch-tiled arrays
    w_map2 = lambda i: (0, 0)           # resident 2-D weights / biases
    w_map3 = lambda i: (0, 0, 0)        # resident stacked 3-D weights

    in_specs = [
        pl.BlockSpec((TB, in_dim), row_map),
        pl.BlockSpec(w1.shape, w_map2),
        pl.BlockSpec(b1.shape, w_map2),
        pl.BlockSpec(w2.shape, w_map2 if fused else w_map3),
        pl.BlockSpec(b2.shape, w_map2),
        pl.BlockSpec(w3.shape, w_map2 if fused else w_map3),
        pl.BlockSpec(b3.shape, w_map2),
    ]

    # Advisory cost estimate for XLA's scheduler.
    if fused:
        hidden_flops = width * width + width * 2
    else:
        hp = width // 2
        hidden_flops = 2 * (hp * hp) + 2 * (hp * 2)
    flops = 2 * B_pad * (in_dim * width + hidden_flops)
    param_bytes = sum(int(a.size) * a.dtype.itemsize
                      for a in (w1, b1, w2, b2, w3, b3))
    bytes_accessed = int(x.size) * x.dtype.itemsize + B_pad * 2 * 4 + param_bytes

    out = pl.pallas_call(
        kernel,
        out_shape=jax.ShapeDtypeStruct((B_pad, 2), jnp.float32),
        grid_spec=pltpu.PrefetchScalarGridSpec(
            num_scalar_prefetch=0,
            grid=(n_tiles,),
            in_specs=in_specs,
            out_specs=pl.BlockSpec((TB, 2), row_map),
        ),
        compiler_params=pltpu.CompilerParams(
            dimension_semantics=("parallel",),
            vmem_limit_bytes=32 * 1024 * 1024,
        ),
        cost_estimate=pl.CostEstimate(
            flops=flops, transcendentals=0, bytes_accessed=bytes_accessed
        ),
    )(x, w1, b1, w2, b2, w3, b3)

    q1 = out[:B, 0:1]
    q2 = out[:B, 1:2]
    return q1, q2


# ----------------------------------------------------------------------------
# Test harness
# ----------------------------------------------------------------------------
def make_params(key, in_dim, hidden_dim):
    """Deterministic synthetic parameters (stand-in for util.weight_init)."""
    def tower(k):
        k1, k2, k3, k4, k5 = jax.random.split(k, 5)
        w1 = jax.random.normal(k1, (in_dim, hidden_dim), jnp.float32) * 0.1
        b1 = jax.random.normal(k4, (1, hidden_dim), jnp.float32) * 0.05
        w2 = jax.random.normal(k2, (hidden_dim, hidden_dim), jnp.float32) * 0.1
        b2 = jax.random.normal(k5, (1, hidden_dim), jnp.float32) * 0.05
        w3 = jax.random.normal(k3, (hidden_dim, 1), jnp.float32) * 0.1
        b3 = jnp.zeros((1, 1), jnp.float32)
        return (w1, b1, w2, b2, w3, b3)

    kq1, kq2 = jax.random.split(key, 2)
    return {"q1": tower(kq1), "q2": tower(kq2)}


def reference_f32(obs, action, params):
    """Exact f32 reference of the PyTorch module (hidden_depth = 2)."""
    x = jnp.concatenate([obs, action], axis=-1)

    def mlp(p):
        w1, b1, w2, b2, w3, b3 = p
        h = jnp.maximum(x @ w1 + b1, 0.0)
        h = jnp.maximum(h @ w2 + b2, 0.0)
        return h @ w3 + b3

    return mlp(params["q1"]), mlp(params["q2"])


def reference_bf16_ops(obs, action, params):
    """Reference with bf16-quantized operands / f32 accumulate (kernel's numerics)."""
    x = jnp.concatenate([obs, action], axis=-1)
    q = lambda a: a.astype(jnp.bfloat16).astype(jnp.float32)

    def mlp(p):
        w1, b1, w2, b2, w3, b3 = p
        h = jnp.maximum(q(x) @ q(w1) + b1, 0.0)
        h = jnp.maximum(q(h) @ q(w2) + b2, 0.0)
        return q(h) @ q(w3) + b3

    return mlp(params["q1"]), mlp(params["q2"])


def _check(batch, obs_dim, action_dim, hidden_dim, seed):
    k = jax.random.PRNGKey(seed)
    k_obs, k_act, k_param = jax.random.split(k, 3)
    obs = jax.random.normal(k_obs, (batch, obs_dim), jnp.float32)
    action = jax.random.normal(k_act, (batch, action_dim), jnp.float32)
    params = make_params(k_param, obs_dim + action_dim, hidden_dim)

    packed = pack_double_q_params(params)          # hoisted: once per weight set
    q1, q2 = double_q_critic(obs, action, packed)
    q1, q2 = jax.block_until_ready((q1, q2))
    assert q1.shape == (batch, 1) and q2.shape == (batch, 1)

    r1q, r2q = reference_bf16_ops(obs, action, params)
    assert jnp.allclose(q1, r1q, atol=2e-3, rtol=2e-3)
    assert jnp.allclose(q2, r2q, atol=2e-3, rtol=2e-3)

    r1, r2 = reference_f32(obs, action, params)    # loose sanity vs f32 module
    assert jnp.allclose(q1, r1, atol=5e-2, rtol=5e-2)
    assert jnp.allclose(q2, r2, atol=5e-2, rtol=5e-2)


if __name__ == "__main__":
    # Fused block-diagonal path (2*H <= 128), even batch.
    _check(batch=32, obs_dim=16, action_dim=8, hidden_dim=32, seed=0)
    # Split-tower path (2*H > 128) with a ragged batch (exercises padding).
    _check(batch=13, obs_dim=16, action_dim=8, hidden_dim=128, seed=1)

    # TODO(synk): the PyTorch module also stashes q1/q2 in self.outputs for
    # logging; that side-effect has no kernel equivalent (values are returned).
    print("KERNEL_OK")
</pallas_src>

<mosaic_0001>
module attributes {stable_mosaic.version = 11 : i64} {
  func.func @_fused_double_q_kernel(%arg0: i32, %arg1: memref<16x24xbf16, #tpu.memory_space<vmem>>, %arg2: memref<24x128xbf16, #tpu.memory_space<vmem>>, %arg3: memref<1x128xf32, #tpu.memory_space<vmem>>, %arg4: memref<128x128xbf16, #tpu.memory_space<vmem>>, %arg5: memref<1x128xf32, #tpu.memory_space<vmem>>, %arg6: memref<128x2xbf16, #tpu.memory_space<vmem>>, %arg7: memref<1x2xf32, #tpu.memory_space<vmem>>, %arg8: memref<16x2xf32, #tpu.memory_space<vmem>>) attributes {dimension_semantics = [#tpu.dimension_semantics<parallel>], iteration_bounds = array<i64: 2>, scalar_prefetch = 0 : i64, scratch_operands = 0 : i64, tpu.core_type = #tpu.core_type<tc>, window_params = [{transform_indices = @transform_0, window_bounds = array<i64: 16, 24>}, {pipeline_mode = #tpu.pipeline_mode<synchronous>, transform_indices = @transform_1, window_bounds = array<i64: 24, 128>}, {pipeline_mode = #tpu.pipeline_mode<synchronous>, transform_indices = @transform_2, window_bounds = array<i64: 1, 128>}, {pipeline_mode = #tpu.pipeline_mode<synchronous>, transform_indices = @transform_3, window_bounds = array<i64: 128, 128>}, {pipeline_mode = #tpu.pipeline_mode<synchronous>, transform_indices = @transform_4, window_bounds = array<i64: 1, 128>}, {pipeline_mode = #tpu.pipeline_mode<synchronous>, transform_indices = @transform_5, window_bounds = array<i64: 128, 2>}, {pipeline_mode = #tpu.pipeline_mode<synchronous>, transform_indices = @transform_6, window_bounds = array<i64: 1, 2>}, {transform_indices = @transform_7, window_bounds = array<i64: 16, 2>}]} {
    %c0 = arith.constant 0 : index
    %c0_0 = arith.constant 0 : index
    %0 = vector.load %arg1[%c0, %c0_0] : memref<16x24xbf16, #tpu.memory_space<vmem>>, vector<16x24xbf16>
    %c0_1 = arith.constant 0 : index
    %c0_2 = arith.constant 0 : index
    %1 = vector.load %arg2[%c0_1, %c0_2] : memref<24x128xbf16, #tpu.memory_space<vmem>>, vector<24x128xbf16>
    %cst = arith.constant dense<0.000000e+00> : vector<16x128xf32>
    %2 = tpu.matmul %0, %1, %cst {dimension_numbers = #tpu.dot_dimension_numbers<[1], [0], [0], [1], [0, 0, 1, 1], [], []>} : vector<16x24xbf16>, vector<24x128xbf16>, vector<16x128xf32> -> vector<16x128xf32>
    %c0_3 = arith.constant 0 : index
    %c0_4 = arith.constant 0 : index
    %3 = vector.load %arg3[%c0_3, %c0_4] : memref<1x128xf32, #tpu.memory_space<vmem>>, vector<1x128xf32>
    %4 = vector.broadcast %3 : vector<1x128xf32> to vector<16x128xf32>
    %5 = arith.addf %2, %4 : vector<16x128xf32>
    %cst_5 = arith.constant 0.000000e+00 : f32
    %6 = vector.broadcast %cst_5 : f32 to vector<16x128xf32>
    %7 = arith.maximumf %5, %6 : vector<16x128xf32>
    %8 = arith.truncf %7 : vector<16x128xf32> to vector<16x128xbf16>
    %c0_6 = arith.constant 0 : index
    %c0_7 = arith.constant 0 : index
    %9 = vector.load %arg4[%c0_6, %c0_7] : memref<128x128xbf16, #tpu.memory_space<vmem>>, vector<128x128xbf16>
    %cst_8 = arith.constant dense<0.000000e+00> : vector<16x128xf32>
    %10 = tpu.matmul %8, %9, %cst_8 {dimension_numbers = #tpu.dot_dimension_numbers<[1], [0], [0], [1], [0, 0, 1, 1], [], []>} : vector<16x128xbf16>, vector<128x128xbf16>, vector<16x128xf32> -> vector<16x128xf32>
    %c0_9 = arith.constant 0 : index
    %c0_10 = arith.constant 0 : index
    %11 = vector.load %arg5[%c0_9, %c0_10] : memref<1x128xf32, #tpu.memory_space<vmem>>, vector<1x128xf32>
    %12 = vector.broadcast %11 : vector<1x128xf32> to vector<16x128xf32>
    %13 = arith.addf %10, %12 : vector<16x128xf32>
    %cst_11 = arith.constant 0.000000e+00 : f32
    %14 = vector.broadcast %cst_11 : f32 to vector<16x128xf32>
    %15 = arith.maximumf %13, %14 : vector<16x128xf32>
    %16 = arith.truncf %15 : vector<16x128xf32> to vector<16x128xbf16>
    %c0_12 = arith.constant 0 : index
    %c0_13 = arith.constant 0 : index
    %17 = vector.load %arg6[%c0_12, %c0_13] : memref<128x2xbf16, #tpu.memory_space<vmem>>, vector<128x2xbf16>
    %cst_14 = arith.constant dense<0.000000e+00> : vector<16x2xf32>
    %18 = tpu.matmul %16, %17, %cst_14 {dimension_numbers = #tpu.dot_dimension_numbers<[1], [0], [0], [1], [0, 0, 1, 1], [], []>} : vector<16x128xbf16>, vector<128x2xbf16>, vector<16x2xf32> -> vector<16x2xf32>
    %c0_15 = arith.constant 0 : index
    %c0_16 = arith.constant 0 : index
    %19 = vector.load %arg7[%c0_15, %c0_16] : memref<1x2xf32, #tpu.memory_space<vmem>>, vector<1x2xf32>
    %20 = vector.broadcast %19 : vector<1x2xf32> to vector<16x2xf32>
    %21 = arith.addf %18, %20 : vector<16x2xf32>
    %c0_17 = arith.constant 0 : index
    %c0_18 = arith.constant 0 : index
    %22 = vector.load %arg8[%c0_17, %c0_18] : memref<16x2xf32, #tpu.memory_space<vmem>>, vector<16x2xf32>
    tpu.vector_store %arg8[%c0_17, %c0_18], %21 {strides = array<i32>} : memref<16x2xf32, #tpu.memory_space<vmem>>, vector<16x2xf32>,
    return
  }
  func.func @transform_0(%arg0: i32) -> (i32, i32) {
    %c0_i32 = arith.constant 0 : i32
    %c0_i32_0 = arith.constant 0 : i32
    return %arg0, %c0_i32 : i32, i32
  }
  func.func @transform_1(%arg0: i32) -> (i32, i32) {
    %c0_i32 = arith.constant 0 : i32
    %c0_i32_0 = arith.constant 0 : i32
    %c0_i32_1 = arith.constant 0 : i32
    return %c0_i32, %c0_i32_0 : i32, i32
  }
  func.func @transform_2(%arg0: i32) -> (i32, i32) {
    %c0_i32 = arith.constant 0 : i32
    %c0_i32_0 = arith.constant 0 : i32
    %c0_i32_1 = arith.constant 0 : i32
    return %c0_i32, %c0_i32_0 : i32, i32
  }
  func.func @transform_3(%arg0: i32) -> (i32, i32) {
    %c0_i32 = arith.constant 0 : i32
    %c0_i32_0 = arith.constant 0 : i32
    %c0_i32_1 = arith.constant 0 : i32
    return %c0_i32, %c0_i32_0 : i32, i32
  }
  func.func @transform_4(%arg0: i32) -> (i32, i32) {
    %c0_i32 = arith.constant 0 : i32
    %c0_i32_0 = arith.constant 0 : i32
    %c0_i32_1 = arith.constant 0 : i32
    return %c0_i32, %c0_i32_0 : i32, i32
  }
  func.func @transform_5(%arg0: i32) -> (i32, i32) {
    %c0_i32 = arith.constant 0 : i32
    %c0_i32_0 = arith.constant 0 : i32
    %c0_i32_1 = arith.constant 0 : i32
    return %c0_i32, %c0_i32_0 : i32, i32
  }
  func.func @transform_6(%arg0: i32) -> (i32, i32) {
    %c0_i32 = arith.constant 0 : i32
    %c0_i32_0 = arith.constant 0 : i32
    %c0_i32_1 = arith.constant 0 : i32
    return %c0_i32, %c0_i32_0 : i32, i32
  }
  func.func @transform_7(%arg0: i32) -> (i32, i32) {
    %c0_i32 = arith.constant 0 : i32
    %c0_i32_0 = arith.constant 0 : i32
    return %arg0, %c0_i32 : i32, i32
  }
}

</mosaic_0001>

<bundles_post_ra>
// kernel: tpu_custom_call.1
= control target key start
LH: loop header
LB: loop body
LE: loop exit
PB: predicated region body
PF: predicated region fallthrough
CT: control target
= control target key end

     0   :  { %s829_s24 = smov 0   ;;  %s937_s0 = inlined_call_operand.vmem [shape: bf16[32,24], index: 0, kind: input, shape index: {}]   ;;  %s938_s1 = inlined_call_operand.vmem [shape: bf16[24,128], index: 1, kind: input, shape index: {}]   ;;  %s939_s2 = inlined_call_operand.vmem [shape: f32[1,128], index: 2, kind: input, shape index: {}]   ;;  %s940_s3 = inlined_call_operand.vmem [shape: bf16[128,128], index: 3, kind: input, shape index: {}]   ;;  %s941_s4 = inlined_call_operand.vmem [shape: f32[1,128], index: 4, kind: input, shape index: {}]   ;;  %s942_s5 = inlined_call_operand.vmem [shape: bf16[128,2], index: 5, kind: input, shape index: {}]   ;;  %s943_s6 = inlined_call_operand.vmem [shape: f32[1,2], index: 6, kind: input, shape index: {}]   ;;  %s944_s7 = inlined_call_operand.vmem [shape: f32[32,2], index: 7, kind: output, shape index: {}]  }
   0x1 LB: > { %s647_s25 = sadd.s32 4294967295, %s785_s24   ;;  %p651_p0 = scmp.ge.s32.totalorder %s785_s24, 1  ;;  %s785_s24 = sphi %s829_s24, %s17_s24  }
   0x2   : > { %p238_p1 = scmp.lt.s32.totalorder %s785_s24, 3 }
   0x4   : > { %p239_p2 = pnand %p651_p0, %p238_p1 }
   0x5   : > { %s652_s30 = sshll.u32 (!%p239_p2), %s647_s25, 1 }
   0x6   : > { %242 = sbr.rel (%p239_p2) target bundleno = 627 (0x273), region = 48  ;;  %p271_p3 = scmp.lt.s32.totalorder (!%p239_p2), %s652_s30, 3 }
   0xb   : > { %v760_v0 = vld [vmem:[%s938_s1 + $0x8] ss:$0 sps:$4 sm:$0xff]   ;;  %vm313_vm0 = vcmask 1043456   ;;  %v787_v1 = vmov 0.0   ;;  %v761_v3 = vld [vmem:[%s938_s1] sm:$0xff]   ;;  %vm788_vm1 = vmmov 0  }
   0xc   : > { %702 = vmatprep.subr.bf16.mxu0 %v787_v1  ;;  %710 = vmatprep.subr.bf16.mxu1 %v787_v1  ;;  %v315_v2 = vsel %vm313_vm0, %v760_v0, 0  ;;  %v763_v4 = vld [vmem:[%s940_s3 + $0x38] sm:$0xff]   ;;  %v764_v5 = vld [vmem:[%s940_s3 + $0x30] sm:$0xff]   ;;  %s946_s30 = smov (!%p271_p3, %s652_s30), 3  ;;  %vm309_vm2 = vcmask 195584   ;;  %v765_v6 = vld [vmem:[%s940_s3 + $0x28] sm:$0xff]  }
   0xd   : > { %706 = vmatprep.mubr.msk.bf16.mxu0 %vm788_vm1, %v787_v1  ;;  %726 = vmatprep.mubr.msk.bf16.mxu1 %vm788_vm1, %v787_v1  ;;  %s653_s12 = sshll.u32 %s946_s30, 2  ;;  %v766_v8 = vld [vmem:[%s940_s3 + $0x20] sm:$0xff]   ;;  %v767_v9 = vld [vmem:[%s940_s3 + $0x18] sm:$0xff]   ;;  %v768_v10 = vld [vmem:[%s940_s3 + $0x10] sm:$0xff]   ;;  %s655_s28 = sshll.u32 %s946_s30, 3  ;;  %vm588_vm3 = vcmask 15360  }
   0xe   : > { %703 = vmatpush3.bf16.msra.mxu0 %v315_v2  ;;  %711 = vmatpush3.bf16.msra.mxu1 %v763_v4  ;;  %s274_s17 = scalar_lea.vmem %s937_s0, %s653_s12  ;;  %v769_v11 = vld [vmem:[%s940_s3 + $0x8] sm:$0xff]   ;;  %v770_v12 = vld [vmem:[%s940_s3] sm:$0xff]   ;;  %v771_v13 = vld [vmem:[%s942_s5 + $0x38] sm:$0xff]   ;;  %s280_s11 = scalar_lea.vmem %s944_s7, %s655_s28 }
   0xf   : > { %704 = vmatprep.subr.bf16.mxu0 %v787_v1  ;;  %712 = vmatprep.subr.bf16.mxu1 %v787_v1  ;;  %v762_v7 = vld [vmem:[%s274_s17] sm:$0xff]   ;;  %v772_v14 = vld [vmem:[%s942_s5 + $0x30] sm:$0xff]   ;;  %v773_v15 = vld [vmem:[%s942_s5 + $0x28] sm:$0xff]  }
  0x10   : > { %v774_v16 = vld [vmem:[%s942_s5 + $0x20] sm:$0xff]   ;;  %v775_v17 = vld [vmem:[%s942_s5 + $0x18] sm:$0xff]   ;;  %v776_v28 = vld [vmem:[%s942_s5 + $0x10] sm:$0xff]  }
  0x11   : > { %v656_v18 = vld [vmem:[%s939_s2] ss:$0 sm:$0xff]  ;;  %v777_v29 = vld [vmem:[%s942_s5 + $0x8] sm:$0xff]  }
  0x12   : > { %705 = vmatpush3.bf16.msra.mxu0 %v761_v3  ;;  %713 = vmatpush3.bf16.msra.mxu1 %v764_v5  ;;  %v778_v30 = vld [vmem:[%s942_s5] sm:$0xff]  }
  0x13   : > { %730 = vmatprep.subr.bf16.mxu0 %v787_v1  ;;  %714 = vmatprep.subr.bf16.mxu1 %v787_v1  ;;  %v661_v31 = vld [vmem:[%s941_s4] ss:$0 sm:$0xff] }
  0x14   : > { %v670_v41 = vld [vmem:[%s943_s6] ss:$0 sm:$0xff] }
  0x15   : > { %707 = vmatmul.mubr.msk.bf16.vlgmr.msra.gmra.mxu0 %vm309_vm2, %v762_v7 }
  0x16   : > { %715 = vmatpush3.bf16.msra.mxu1 %v765_v6  ;;  %746 = vmatprep.mubr.msk.bf16.mxu0 %vm788_vm1, %v787_v1 }
  0x17   : > { %716 = vmatprep.subr.bf16.mxu1 %v787_v1  ;;  %731 = vmatpush3.bf16.msra.mxu0 %v771_v13 }
  0x18   : > { %732 = vmatprep.subr.bf16.mxu0 %v787_v1 }
  0x1a   : > { %717 = vmatpush3.bf16.msra.mxu1 %v766_v8 }
  0x1b   : > { %718 = vmatprep.subr.bf16.mxu1 %v787_v1  ;;  %733 = vmatpush3.bf16.msra.mxu0 %v772_v14 }
  0x1c   : > { %734 = vmatprep.subr.bf16.mxu0 %v787_v1 }
  0x1e   : > { %719 = vmatpush3.bf16.msra.mxu1 %v767_v9 }
  0x1f   : > { %720 = vmatprep.subr.bf16.mxu1 %v787_v1  ;;  %735 = vmatpush3.bf16.msra.mxu0 %v773_v15 }
  0x20   : > { %736 = vmatprep.subr.bf16.mxu0 %v787_v1 }
  0x22   : > { %721 = vmatpush3.bf16.msra.mxu1 %v768_v10 }
  0x23   : > { %722 = vmatprep.subr.bf16.mxu1 %v787_v1  ;;  %737 = vmatpush3.bf16.msra.mxu0 %v774_v16 }
  0x24   : > { %738 = vmatprep.subr.bf16.mxu0 %v787_v1 }
  0x26   : > { %723 = vmatpush3.bf16.msra.mxu1 %v769_v11 }
  0x27   : > { %724 = vmatprep.subr.bf16.mxu1 %v787_v1  ;;  %739 = vmatpush3.bf16.msra.mxu0 %v775_v17 }
  0x28   : > { %740 = vmatprep.subr.bf16.mxu0 %v787_v1 }
  0x2a   : > { %725 = vmatpush3.bf16.msra.mxu1 %v770_v12 }
  0x2b   : > { %741 = vmatpush3.bf16.msra.mxu0 %v776_v28 }
  0x2c   : > { %742 = vmatprep.subr.bf16.mxu0 %v787_v1 }
  0x2f   : > { %743 = vmatpush3.bf16.msra.mxu0 %v777_v29 }
  0x30   : > { %744 = vmatprep.subr.bf16.mxu0 %v787_v1 }
  0x33   : > { %745 = vmatpush3.bf16.msra.mxu0 %v778_v30 }
  0xd5   : > { %v351_v19 = vpop.f32.mrf.mxu0 }
  0xd6   : > { %v352_v21 = vadd.f32 %v656_v18, %v351_v19 }
  0xd7   : > { %v708_v20 = vpop.f32.mrf.mxu0 }
  0xd8   : > { %v358_v25 = vmax.f32 %v352_v21, 0.0 }
  0xd9   : > { %v354_v22 = vpop.f32.mrf.mxu0 }
  0xda   : > { %v355_v23 = vadd.f32 %v656_v18, %v354_v22 }
  0xdb   : > { %v709_v24 = vpop.f32.mrf.mxu0 }
  0xdc   : > { %v359_v26 = vmax.f32 %v355_v23, 0.0 }
  0xde   : > { %v360_v27 = vpack.c.bf16 %v359_v26, %v358_v25 }
  0xe0   : > { %727 = vmatmul.mubr.bf16.vlgmr.msra.gmra.mxu1 %v360_v27 }
 0x1a0   : > { %v466_v32 = vpop.f32.mrf.mxu1 }
 0x1a1   : > { %v467_v34 = vadd.f32 %v661_v31, %v466_v32 }
 0x1a2   : > { %v728_v33 = vpop.f32.mrf.mxu1 }
 0x1a3   : > { %v473_v38 = vmax.f32 %v467_v34, 0.0 }
 0x1a4   : > { %v469_v35 = vpop.f32.mrf.mxu1 }
 0x1a5   : > { %v470_v36 = vadd.f32 %v661_v31, %v469_v35 }
 0x1a6   : > { %v729_v37 = vpop.f32.mrf.mxu1 }
 0x1a7   : > { %v474_v39 = vmax.f32 %v470_v36, 0.0 }
 0x1a9   : > { %v475_v40 = vpack.c.bf16 %v474_v39, %v473_v38 }
 0x1ab   : > { %747 = vmatmul.mubr.bf16.vlgmr.msra.gmra.mxu0 %v475_v40 }
 0x26b   : > { %v581_v42 = vpop.f32.mrf.mxu0 }
 0x26c   : > { %v582_v43 = vadd.f32 %v670_v41, %v581_v42 }
 0x26d   : > { %v748_v44 = vpop.f32.mrf.mxu0 }
 0x26e   : > { %589 = vst.msk [vmem:[%s280_s11] sm:$0xff] %vm588_vm3, %v582_v43 }
 0x26f   : > { %v584_v45 = vpop.f32.mrf.mxu0 }
 0x270   : > { %v585_v46 = vadd.f32 %v670_v41, %v584_v45 }
 0x271   : > { %v749_v47 = vpop.f32.mrf.mxu0 }
 0x272   : > { %590 = vst.msk [vmem:[%s280_s11 + $0x8] sm:$0xff] %vm588_vm3, %v585_v46 }
 0x273 PF: > { %s17_s24 = sadd.s32 1, %s785_s24  }
 0x274   : > { %p14_p4 = scmp.ge.s32.totalorder %s17_s24, 4  }
 0x276   :  { %16 = sbr.rel (!%p14_p4) target bundleno = 1 (0x1), region = 78 }

</bundles_post_ra>
